<compile_context>
chip_gen: v5e
topology: v5e:2x2
jax: 0.10.0
libtpu: 0.0.40
codegen_flags: <defaults>
</compile_context>

<pallas_src>
import functools

import jax
import jax.numpy as jnp
from jax.experimental import pallas as pl
from jax.experimental.pallas import tpu as pltpu

DROPOUT = 0.2
# Compare on the top 24 bits so the threshold check stays in the positive
# int range regardless of signed/unsigned lowering of the comparison.
_DROP_THRESH_24 = int(DROPOUT * (1 << 24))
_DROP_SCALE = 1.0 / (1.0 - DROPOUT)


def _round_up(n, m):
    return ((n + m - 1) // m) * m


def _pad2d(a, rows, cols):
    r, c = a.shape
    if r == rows and c == cols:
        return a
    return jnp.pad(a, ((0, rows - r), (0, cols - c)))


def _ffn_kernel(x_ref, w1_ref, b1_ref, w2_ref, b2_ref, *rest, training):
    # Grid: (row tiles [parallel], hidden-dim blocks [arbitrary / reduction]).
    if training:
        bits_ref, o_ref, acc_ref = rest
    else:
        o_ref, acc_ref = rest

    hb = pl.program_id(1)

    @pl.when(hb == 0)
    def _init():
        acc_ref[...] = jnp.zeros_like(acc_ref)

    # (TM, TH) hidden slab for this h-block.  ReLU and b1 are elementwise in H,
    # so applying them per block is exact.
    h = jnp.dot(x_ref[...], w1_ref[...], preferred_element_type=jnp.float32)
    h = jnp.maximum(h + b1_ref[...], 0.0)
    acc_ref[...] += jnp.dot(h.astype(w2_ref.dtype), w2_ref[...],
                            preferred_element_type=jnp.float32)

    # Epilogue (second bias + dropout + store) only once, at the last h-block.
    @pl.when(hb == pl.num_programs(1) - 1)
    def _finalize():
        y = acc_ref[...] + b2_ref[...]
        if training:
            keep = (bits_ref[...] >> 8) >= jnp.uint32(_DROP_THRESH_24)
            y = jnp.where(keep, y * _DROP_SCALE, 0.0)
        o_ref[...] = y.astype(o_ref.dtype)


def feed_forward(x, params, *, training=False, key=None,
                 row_tile=128, h_tile=512, compute_dtype=jnp.float32):
    """x: (B, T, C).  params: w1 (C, 4C), b1 (4C,), w2 (4C, C), b2 (C,)."""
    B, T, C = x.shape
    H = params["w1"].shape[1]
    N = B * T

    TM = row_tile
    C_pad = _round_up(C, 128)
    TH = min(h_tile, _round_up(H, 128))
    H_pad = _round_up(H, TH)
    N_pad = _round_up(N, TM)

    # Zero-padding is exact: padded x columns / w1 rows contribute 0, padded
    # hidden units have bias 0 -> relu(0)=0, padded output columns are sliced.
    x2 = _pad2d(x.reshape(N, C), N_pad, C_pad).astype(compute_dtype)
    w1 = _pad2d(params["w1"], C_pad, H_pad).astype(compute_dtype)
    w2 = _pad2d(params["w2"], H_pad, C_pad).astype(compute_dtype)
    b1 = jnp.pad(params["b1"], (0, H_pad - H)).reshape(1, H_pad).astype(jnp.float32)
    b2 = jnp.pad(params["b2"], (0, C_pad - C)).reshape(1, C_pad).astype(jnp.float32)

    in_specs = [
        pl.BlockSpec((TM, C_pad), lambda i, h: (i, 0)),   # x row tile
        pl.BlockSpec((C_pad, TH), lambda i, h: (0, h)),   # w1 h-block (streamed)
        pl.BlockSpec((1, TH), lambda i, h: (0, h)),       # b1 h-block
        pl.BlockSpec((TH, C_pad), lambda i, h: (h, 0)),   # w2 h-block (streamed)
        pl.BlockSpec((1, C_pad), lambda i, h: (0, 0)),    # b2
    ]
    operands = [x2, w1, b1, w2, b2]

    if training:
        if key is None:
            key = jax.random.PRNGKey(0)
        bits = jax.random.bits(key, (N_pad, C_pad), dtype=jnp.uint32)
        in_specs.append(pl.BlockSpec((TM, C_pad), lambda i, h: (i, 0)))
        operands.append(bits)

    # Explicit scoped-VMEM budget: double-buffered streams + f32 accumulator,
    # plus headroom for the (TM, TH) f32 intermediate.
    itm = jnp.dtype(compute_dtype).itemsize
    out_itm = jnp.dtype(x.dtype).itemsize
    need = 2 * (TM * C_pad * itm                      # x
                + C_pad * TH * itm + TH * 4           # w1, b1
                + TH * C_pad * itm + C_pad * 4        # w2, b2
                + TM * C_pad * out_itm)               # out
    if training:
        need += 2 * TM * C_pad * 4                    # dropout bits
    need += TM * C_pad * 4                            # accumulator scratch
    need += 2 * TM * TH * 4                           # hidden intermediate headroom
    vmem_limit = min(max(int(need * 1.5), 32 << 20), 64 << 20)

    out = pl.pallas_call(
        functools.partial(_ffn_kernel, training=training),
        out_shape=jax.ShapeDtypeStruct((N_pad, C_pad), x.dtype),
        grid=(N_pad // TM, H_pad // TH),
        in_specs=in_specs,
        out_specs=pl.BlockSpec((TM, C_pad), lambda i, h: (i, 0)),
        scratch_shapes=[pltpu.VMEM((TM, C_pad), jnp.float32)],
        compiler_params=pltpu.CompilerParams(
            dimension_semantics=("parallel", "arbitrary"),
            vmem_limit_bytes=vmem_limit),
    )(*operands)

    return out[:N, :C].reshape(B, T, C)


def init_params(key, n_embd):
    """Deterministic init mirroring nn.Linear's U(-1/sqrt(fan_in), 1/sqrt(fan_in))."""
    h = 4 * n_embd
    k1, k2, k3, k4 = jax.random.split(key, 4)
    s1 = 1.0 / (n_embd ** 0.5)
    s2 = 1.0 / (h ** 0.5)
    return {
        "w1": jax.random.uniform(k1, (n_embd, h), jnp.float32, -s1, s1),
        "b1": jax.random.uniform(k2, (h,), jnp.float32, -s1, s1),
        "w2": jax.random.uniform(k3, (h, n_embd), jnp.float32, -s2, s2),
        "b2": jax.random.uniform(k4, (n_embd,), jnp.float32, -s2, s2),
    }


def feed_forward_ref(x, params):
    """Pure-JAX reference (eval mode: dropout = identity)."""
    h = jnp.maximum(x @ params["w1"] + params["b1"], 0.0)
    return h @ params["w2"] + params["b2"]


if __name__ == "__main__":
    key = jax.random.PRNGKey(0)
    kp, kx, kd = jax.random.split(key, 3)

    B, T, n_embd = 2, 8, 32        # small shapes consistent with the module
    params = init_params(kp, n_embd)
    x = jax.random.normal(kx, (B, T, n_embd), dtype=jnp.float32)

    # Eval mode (dropout = identity, as in model.eval()), f32 compute.
    y = jax.block_until_ready(feed_forward(x, params, training=False))
    y_ref = feed_forward_ref(x, params)
    assert jnp.allclose(y, y_ref, atol=1e-5, rtol=1e-5), "f32 mismatch vs reference"

    # bf16 matmul operands (perf config for v6e/v7x MXU), f32 accumulation.
    y_bf16 = jax.block_until_ready(
        feed_forward(x, params, training=False, compute_dtype=jnp.bfloat16))
    assert jnp.allclose(y_bf16, y_ref, atol=5e-2, rtol=5e-2), "bf16 mismatch"

    # Training mode: in-kernel inverted dropout (p=0.2) from uint32 random bits.
    # TODO(synk): dropout mask cannot bit-match torch's RNG stream; semantics match.
    y_train = jax.block_until_ready(feed_forward(x, params, training=True, key=kd))
    dropped = float(jnp.mean((y_train == 0.0).astype(jnp.float32)))
    kept_ok = jnp.where(y_train == 0.0, True,
                        jnp.isclose(y_train, y * _DROP_SCALE, atol=1e-4, rtol=1e-4))
    assert 0.05 < dropped < 0.5, "dropout rate looks wrong"
    assert bool(jnp.all(kept_ok)), "kept values not scaled by 1/(1-p)"

    print("KERNEL_OK")
</pallas_src>

<mosaic_0001>
module attributes {stable_mosaic.version = 11 : i64} {
  func.func @_ffn_kernel(%arg0: i32, %arg1: i32, %arg2: memref<128x128xf32, #tpu.memory_space<vmem>>, %arg3: memref<128x128xf32, #tpu.memory_space<vmem>>, %arg4: memref<1x128xf32, #tpu.memory_space<vmem>>, %arg5: memref<128x128xf32, #tpu.memory_space<vmem>>, %arg6: memref<1x128xf32, #tpu.memory_space<vmem>>, %arg7: memref<128x128xf32, #tpu.memory_space<vmem>>, %arg8: memref<128x128xf32, #tpu.memory_space<vmem>>) attributes {dimension_semantics = [#tpu.dimension_semantics<parallel>, #tpu.dimension_semantics<arbitrary>], iteration_bounds = array<i64: 1, 1>, scalar_prefetch = 0 : i64, scratch_operands = 1 : i64, tpu.core_type = #tpu.core_type<tc>, window_params = [{transform_indices = @transform_0, window_bounds = array<i64: 128, 128>}, {transform_indices = @transform_1, window_bounds = array<i64: 128, 128>}, {transform_indices = @transform_2, window_bounds = array<i64: 1, 128>}, {transform_indices = @transform_3, window_bounds = array<i64: 128, 128>}, {pipeline_mode = #tpu.pipeline_mode<synchronous>, transform_indices = @transform_4, window_bounds = array<i64: 1, 128>}, {transform_indices = @transform_5, window_bounds = array<i64: 128, 128>}]} {
    %c0_i32 = arith.constant 0 : i32
    %0 = arith.cmpi eq, %arg1, %c0_i32 : i32
    %1 = arith.extui %0 : i1 to i32
    %c0_i32_0 = arith.constant 0 : i32
    %2 = arith.cmpi ne, %1, %c0_i32_0 : i32
    scf.if %2 {
      %cst_16 = arith.constant 0.000000e+00 : f32
      %19 = vector.broadcast %cst_16 : f32 to vector<128x128xf32>
      %c0_17 = arith.constant 0 : index
      %c0_18 = arith.constant 0 : index
      %20 = vector.load %arg8[%c0_17, %c0_18] : memref<128x128xf32, #tpu.memory_space<vmem>>, vector<128x128xf32>
      tpu.vector_store %arg8[%c0_17, %c0_18], %19 {strides = array<i32>} : memref<128x128xf32, #tpu.memory_space<vmem>>, vector<128x128xf32>,
    } else {
    }
    %c0 = arith.constant 0 : index
    %c0_1 = arith.constant 0 : index
    %3 = vector.load %arg2[%c0, %c0_1] : memref<128x128xf32, #tpu.memory_space<vmem>>, vector<128x128xf32>
    %c0_2 = arith.constant 0 : index
    %c0_3 = arith.constant 0 : index
    %4 = vector.load %arg3[%c0_2, %c0_3] : memref<128x128xf32, #tpu.memory_space<vmem>>, vector<128x128xf32>
    %cst = arith.constant dense<0.000000e+00> : vector<128x128xf32>
    %5 = tpu.matmul %3, %4, %cst {dimension_numbers = #tpu.dot_dimension_numbers<[1], [0], [0], [1], [0, 0, 1, 1], [], []>} : vector<128x128xf32>, vector<128x128xf32>, vector<128x128xf32> -> vector<128x128xf32>
    %c0_4 = arith.constant 0 : index
    %c0_5 = arith.constant 0 : index
    %6 = vector.load %arg4[%c0_4, %c0_5] : memref<1x128xf32, #tpu.memory_space<vmem>>, vector<1x128xf32>
    %7 = vector.broadcast %6 : vector<1x128xf32> to vector<128x128xf32>
    %8 = arith.addf %5, %7 : vector<128x128xf32>
    %cst_6 = arith.constant 0.000000e+00 : f32
    %9 = vector.broadcast %cst_6 : f32 to vector<128x128xf32>
    %10 = arith.maximumf %8, %9 : vector<128x128xf32>
    %c0_7 = arith.constant 0 : index
    %c0_8 = arith.constant 0 : index
    %11 = vector.load %arg8[%c0_7, %c0_8] : memref<128x128xf32, #tpu.memory_space<vmem>>, vector<128x128xf32>
    %c0_9 = arith.constant 0 : index
    %c0_10 = arith.constant 0 : index
    %12 = vector.load %arg5[%c0_9, %c0_10] : memref<128x128xf32, #tpu.memory_space<vmem>>, vector<128x128xf32>
    %cst_11 = arith.constant dense<0.000000e+00> : vector<128x128xf32>
    %13 = tpu.matmul %10, %12, %cst_11 {dimension_numbers = #tpu.dot_dimension_numbers<[1], [0], [0], [1], [0, 0, 1, 1], [], []>} : vector<128x128xf32>, vector<128x128xf32>, vector<128x128xf32> -> vector<128x128xf32>
    %14 = arith.addf %11, %13 : vector<128x128xf32>
    %c0_12 = arith.constant 0 : index
    %c0_13 = arith.constant 0 : index
    %15 = vector.load %arg8[%c0_12, %c0_13] : memref<128x128xf32, #tpu.memory_space<vmem>>, vector<128x128xf32>
    tpu.vector_store %arg8[%c0_12, %c0_13], %14 {strides = array<i32>} : memref<128x128xf32, #tpu.memory_space<vmem>>, vector<128x128xf32>,
    %c0_i32_14 = arith.constant 0 : i32
    %16 = arith.cmpi eq, %arg1, %c0_i32_14 : i32
    %17 = arith.extui %16 : i1 to i32
    %c0_i32_15 = arith.constant 0 : i32
    %18 = arith.cmpi ne, %17, %c0_i32_15 : i32
    scf.if %18 {
      %c0_16 = arith.constant 0 : index
      %c0_17 = arith.constant 0 : index
      %19 = vector.load %arg8[%c0_16, %c0_17] : memref<128x128xf32, #tpu.memory_space<vmem>>, vector<128x128xf32>
      %c0_18 = arith.constant 0 : index
      %c0_19 = arith.constant 0 : index
      %20 = vector.load %arg6[%c0_18, %c0_19] : memref<1x128xf32, #tpu.memory_space<vmem>>, vector<1x128xf32>
      %21 = vector.broadcast %20 : vector<1x128xf32> to vector<128x128xf32>
      %22 = arith.addf %19, %21 : vector<128x128xf32>
      %c0_20 = arith.constant 0 : index
      %c0_21 = arith.constant 0 : index
      %23 = vector.load %arg7[%c0_20, %c0_21] : memref<128x128xf32, #tpu.memory_space<vmem>>, vector<128x128xf32>
      tpu.vector_store %arg7[%c0_20, %c0_21], %22 {strides = array<i32>} : memref<128x128xf32, #tpu.memory_space<vmem>>, vector<128x128xf32>,
    } else {
    }
    return
  }
  func.func @transform_0(%arg0: i32, %arg1: i32) -> (i32, i32) {
    %c0_i32 = arith.constant 0 : i32
    %c0_i32_0 = arith.constant 0 : i32
    return %arg0, %c0_i32 : i32, i32
  }
  func.func @transform_1(%arg0: i32, %arg1: i32) -> (i32, i32) {
    %c0_i32 = arith.constant 0 : i32
    %c0_i32_0 = arith.constant 0 : i32
    return %c0_i32, %arg1 : i32, i32
  }
  func.func @transform_2(%arg0: i32, %arg1: i32) -> (i32, i32) {
    %c0_i32 = arith.constant 0 : i32
    %c0_i32_0 = arith.constant 0 : i32
    return %c0_i32, %arg1 : i32, i32
  }
  func.func @transform_3(%arg0: i32, %arg1: i32) -> (i32, i32) {
    %c0_i32 = arith.constant 0 : i32
    %c0_i32_0 = arith.constant 0 : i32
    return %arg1, %c0_i32 : i32, i32
  }
  func.func @transform_4(%arg0: i32, %arg1: i32) -> (i32, i32) {
    %c0_i32 = arith.constant 0 : i32
    %c0_i32_0 = arith.constant 0 : i32
    %c0_i32_1 = arith.constant 0 : i32
    return %c0_i32, %c0_i32_0 : i32, i32
  }
  func.func @transform_5(%arg0: i32, %arg1: i32) -> (i32, i32) {
    %c0_i32 = arith.constant 0 : i32
    %c0_i32_0 = arith.constant 0 : i32
    return %arg0, %c0_i32 : i32, i32
  }
}

</mosaic_0001>

<bundles_post_ra>
// kernel: tpu_custom_call.1
= control target key start
LH: loop header
LB: loop body
LE: loop exit
PB: predicated region body
PF: predicated region fallthrough
CT: control target
= control target key end

     0   :  { %10 = vsyncpa [#allocation4], 0  ;;  %s617_s0 = inlined_call_operand.hbm [shape: f32[128,128], index: 0, kind: input, shape index: {}]   ;;  %s618_s1 = inlined_call_operand.hbm [shape: f32[128,128], index: 1, kind: input, shape index: {}]   ;;  %s619_s2 = inlined_call_operand.vmem [shape: f32[1,128], index: 2, kind: input, shape index: {}]   ;;  %s620_s3 = inlined_call_operand.hbm [shape: f32[128,128], index: 3, kind: input, shape index: {}]   ;;  %s621_s4 = inlined_call_operand.vmem [shape: f32[1,128], index: 4, kind: input, shape index: {}]   ;;  %s622_s5 = inlined_call_operand.hbm [shape: f32[128,128], index: 5, kind: output, shape index: {}]  }
   0x1   :  { %11 = vsyncpa [#allocation7], 0 }
   0x2   :  { %12 = vsyncpa [#allocation5], 0  ;;  %s30_s20 = sshll.u32 %s618_s1, 4  ;;  %s551_s21 = smov [#allocation6]   ;;  %s31_s20 = int_to_ptr.hbm [resolvable:$true] %s30_s20 }
   0x3   :  { %s32_s22 = sshll.u32 %s551_s21, 4  ;;  %s17_s25 = sshll.u32 %s617_s0, 4  ;;  %s33_s22 = int_to_ptr.vmem [resolvable:$true] %s32_s22  ;;  %s18_s25 = int_to_ptr.hbm [resolvable:$true] %s17_s25 }
   0x4   :  { %s552_s26 = smov 128   ;;  %s553_s27 = smov 8  }
   0x5   :  { %38 = dma.hbm_to_vmem [thread:$0]  %s31_s20, 2048, %s33_s22, [#allocation7], %s552_s26, %s552_s26, %s553_s27  }
   0x6   :  { %s554_s28 = smov [#allocation3]   ;;  %s45_s1 = sshll.u32 %s620_s3, 4  ;;  %s46_s1 = int_to_ptr.hbm [resolvable:$true] %s45_s1 }
   0x7   :  { %s19_s29 = sshll.u32 %s554_s28, 4  ;;  %s555_s0 = smov [#allocation8]   ;;  %s20_s29 = int_to_ptr.vmem [resolvable:$true] %s19_s29 }
   0x8   :  { %25 = dma.hbm_to_vmem [thread:$0]  %s18_s25, 2048, %s20_s29, [#allocation4], %s552_s26, %s552_s26, %s553_s27  }
   0x9   :  { %s47_s7 = sshll.u32 %s555_s0, 4  ;;  %s48_s7 = int_to_ptr.vmem [resolvable:$true] %s47_s7 }
   0xa   :  { %53 = dma.hbm_to_vmem [thread:$0]  %s46_s1, 2048, %s48_s7, [#allocation7], %s552_s26, %s552_s26, %s553_s27  }
   0xb   :  { %545 = dma.done.wait [#allocation4], 2048  }
   0xc   :  { %546 = vsyncadd [#allocation4], 4294965248 }
   0xd   :  { %547 = dma.done.wait [#allocation7], 4096  }
   0xe   :  { %548 = vsyncadd [#allocation7], 4294963200  ;;  %v119_v0 = vld [vmem:[#allocation6 + $0x78] sm:$0xff]  ;;  %v118_v1 = vld [vmem:[#allocation6 + $0x70] sm:$0xff]  ;;  %s395_s13 = sshll.u32 %s622_s5, 4  ;;  %s396_s13 = int_to_ptr.hbm [resolvable:$true] %s395_s13 }
   0xf   :  { %409 = vmatpush.msra.mxu2 %v119_v0  ;;  %124 = vmatpush.msra.mxu0 %v119_v0  ;;  %v117_v2 = vld [vmem:[#allocation6 + $0x68] sm:$0xff]  ;;  %v116_v3 = vld [vmem:[#allocation6 + $0x60] sm:$0xff]  ;;  %v115_v4 = vld [vmem:[#allocation6 + $0x58] sm:$0xff] }
  0x10   :  { %v114_v5 = vld [vmem:[#allocation6 + $0x50] sm:$0xff]  ;;  %v113_v6 = vld [vmem:[#allocation6 + $0x48] sm:$0xff]  ;;  %v112_v7 = vld [vmem:[#allocation6 + $0x40] sm:$0xff] }
  0x11   :  { %410 = vmatpush.msra.mxu2 %v118_v1  ;;  %125 = vmatpush.msra.mxu0 %v118_v1  ;;  %v111_v8 = vld [vmem:[#allocation6 + $0x38] sm:$0xff]  ;;  %v110_v9 = vld [vmem:[#allocation6 + $0x30] sm:$0xff]  ;;  %v109_v10 = vld [vmem:[#allocation6 + $0x28] sm:$0xff] }
  0x12   :  { %v108_v11 = vld [vmem:[#allocation6 + $0x20] sm:$0xff]  ;;  %v107_v12 = vld [vmem:[#allocation6 + $0x18] sm:$0xff]  ;;  %v106_v13 = vld [vmem:[#allocation6 + $0x10] sm:$0xff] }
  0x13   :  { %411 = vmatpush.msra.mxu2 %v117_v2  ;;  %126 = vmatpush.msra.mxu0 %v117_v2  ;;  %v105_v14 = vld [vmem:[#allocation6 + $0x8] sm:$0xff]  ;;  %v104_v15 = vld [vmem:[#allocation6] sm:$0xff]  ;;  %v98_v20 = vld [vmem:[#allocation3 + $0x50] sm:$0xff] }
  0x14   :  { %v96_v16 = vld [vmem:[#allocation3 + $0x40] sm:$0xff]  ;;  %v97_v18 = vld [vmem:[#allocation3 + $0x48] sm:$0xff]  ;;  %v90_v21 = vld [vmem:[#allocation3 + $0x10] sm:$0xff] }
  0x15   :  { %412 = vmatpush.msra.mxu2 %v116_v3  ;;  %127 = vmatpush.msra.mxu0 %v116_v3  ;;  %v88_v17 = vld [vmem:[#allocation3] sm:$0xff]  ;;  %v89_v19 = vld [vmem:[#allocation3 + $0x8] sm:$0xff]  ;;  %v99_v22 = vld [vmem:[#allocation3 + $0x58] sm:$0xff] }
  0x16   :  { %v91_v23 = vld [vmem:[#allocation3 + $0x18] sm:$0xff]  ;;  %v235_v25 = vld [vmem:[#allocation8 + $0x70] sm:$0xff]  ;;  %v234_v26 = vld [vmem:[#allocation8 + $0x68] sm:$0xff] }
  0x17   :  { %413 = vmatpush.msra.mxu2 %v115_v4  ;;  %128 = vmatpush.msra.mxu0 %v115_v4  ;;  %v236_v24 = vld [vmem:[#allocation8 + $0x78] sm:$0xff]  ;;  %v233_v27 = vld [vmem:[#allocation8 + $0x60] sm:$0xff]  ;;  %v231_v31 = vld [vmem:[#allocation8 + $0x50] sm:$0xff] }
  0x18   :  { %425 = vmatpush.msra.mxu3 %v236_v24  ;;  %237 = vmatpush.msra.mxu1 %v236_v24  ;;  %v100_v28 = vld [vmem:[#allocation3 + $0x60] sm:$0xff]  ;;  %v232_v30 = vld [vmem:[#allocation8 + $0x58] sm:$0xff]  ;;  %v230_v32 = vld [vmem:[#allocation8 + $0x48] sm:$0xff] }
  0x19   :  { %414 = vmatpush.msra.mxu2 %v114_v5  ;;  %129 = vmatpush.msra.mxu0 %v114_v5  ;;  %v92_v29 = vld [vmem:[#allocation3 + $0x20] sm:$0xff]  ;;  %v101_v34 = vld [vmem:[#allocation3 + $0x68] sm:$0xff]  ;;  %v228_v36 = vld [vmem:[#allocation8 + $0x38] sm:$0xff] }
  0x1a   :  { %426 = vmatpush.msra.mxu3 %v235_v25  ;;  %238 = vmatpush.msra.mxu1 %v235_v25  ;;  %v229_v33 = vld [vmem:[#allocation8 + $0x40] sm:$0xff]  ;;  %v93_v35 = vld [vmem:[#allocation3 + $0x28] sm:$0xff]  ;;  %v227_v37 = vld [vmem:[#allocation8 + $0x30] sm:$0xff] }
  0x1b   :  { %415 = vmatpush.msra.mxu2 %v113_v6  ;;  %130 = vmatpush.msra.mxu0 %v113_v6  ;;  %v226_v38 = vld [vmem:[#allocation8 + $0x28] sm:$0xff]  ;;  %v225_v39 = vld [vmem:[#allocation8 + $0x20] sm:$0xff]  ;;  %v102_v40 = vld [vmem:[#allocation3 + $0x70] sm:$0xff] }
  0x1c   :  { %427 = vmatpush.msra.mxu3 %v234_v26  ;;  %239 = vmatpush.msra.mxu1 %v234_v26  ;;  %v94_v41 = vld [vmem:[#allocation3 + $0x30] sm:$0xff]  ;;  %v224_v42 = vld [vmem:[#allocation8 + $0x18] sm:$0xff]  ;;  %v222_v46 = vld [vmem:[#allocation8 + $0x8] sm:$0xff] }
  0x1d   :  { %416 = vmatpush.msra.mxu2 %v112_v7  ;;  %131 = vmatpush.msra.mxu0 %v112_v7  ;;  %v103_v43 = vld [vmem:[#allocation3 + $0x78] sm:$0xff]  ;;  %v223_v45 = vld [vmem:[#allocation8 + $0x10] sm:$0xff]  ;;  %v221_v47 = vld [vmem:[#allocation8] sm:$0xff] }
  0x1e   :  { %428 = vmatpush.msra.mxu3 %v233_v27  ;;  %240 = vmatpush.msra.mxu1 %v233_v27  ;;  %v95_v44 = vld [vmem:[#allocation3 + $0x38] sm:$0xff]  ;;  %v447_v48 = vld [vmem:[%s619_s2] ss:$0 sm:$0xff] }
  0x1f   :  { %417 = vmatpush.msra.mxu2 %v111_v8  ;;  %132 = vmatpush.msra.mxu0 %v111_v8 }
  0x20   :  { %429 = vmatpush.msra.mxu3 %v232_v30  ;;  %241 = vmatpush.msra.mxu1 %v232_v30 }
  0x21   :  { %418 = vmatpush.msra.mxu2 %v110_v9  ;;  %133 = vmatpush.msra.mxu0 %v110_v9 }
  0x22   :  { %430 = vmatpush.msra.mxu3 %v231_v31  ;;  %242 = vmatpush.msra.mxu1 %v231_v31 }
  0x23   :  { %419 = vmatpush.msra.mxu2 %v109_v10  ;;  %134 = vmatpush.msra.mxu0 %v109_v10 }
  0x24   :  { %431 = vmatpush.msra.mxu3 %v230_v32  ;;  %243 = vmatpush.msra.mxu1 %v230_v32 }
  0x25   :  { %420 = vmatpush.msra.mxu2 %v108_v11  ;;  %135 = vmatpush.msra.mxu0 %v108_v11 }
  0x26   :  { %432 = vmatpush.msra.mxu3 %v229_v33  ;;  %244 = vmatpush.msra.mxu1 %v229_v33  ;;  %v448_v33 = vld [vmem:[%s621_s4] ss:$0 sm:$0xff]  ;;  %s556_s4 = smov [#allocation9]  }
  0x27   :  { %421 = vmatpush.msra.mxu2 %v107_v12  ;;  %136 = vmatpush.msra.mxu0 %v107_v12  ;;  %s393_s10 = sshll.u32 %s556_s4, 4  ;;  %s394_s10 = int_to_ptr.vmem [resolvable:$true] %s393_s10 }
  0x28   :  { %433 = vmatpush.msra.mxu3 %v228_v36  ;;  %245 = vmatpush.msra.mxu1 %v228_v36 }
  0x29   :  { %422 = vmatpush.msra.mxu2 %v106_v13  ;;  %137 = vmatpush.msra.mxu0 %v106_v13 }
  0x2a   :  { %434 = vmatpush.msra.mxu3 %v227_v37  ;;  %246 = vmatpush.msra.mxu1 %v227_v37 }
  0x2b   :  { %423 = vmatpush.msra.mxu2 %v105_v14  ;;  %138 = vmatpush.msra.mxu0 %v105_v14 }
  0x2c   :  { %435 = vmatpush.msra.mxu3 %v226_v38  ;;  %247 = vmatpush.msra.mxu1 %v226_v38 }
  0x2d   :  { %424 = vmatpush.msra.mxu2 %v104_v15  ;;  %139 = vmatpush.msra.mxu0 %v104_v15 }
  0x2e   :  { %164 = vmatmul.f32.vlgmr.msra.gmra.mxu2 %v96_v16  ;;  %140 = vmatmul.f32.vlgmr.msra.gmra.mxu0 %v88_v17 }
  0x2f   :  { %436 = vmatpush.msra.mxu3 %v225_v39  ;;  %248 = vmatpush.msra.mxu1 %v225_v39 }
  0x31   :  { %437 = vmatpush.msra.mxu3 %v224_v42  ;;  %249 = vmatpush.msra.mxu1 %v224_v42 }
  0x33   :  { %438 = vmatpush.msra.mxu3 %v223_v45  ;;  %250 = vmatpush.msra.mxu1 %v223_v45 }
  0x35   :  { %439 = vmatpush.msra.mxu3 %v222_v46  ;;  %251 = vmatpush.msra.mxu1 %v222_v46 }
  0x36   :  { %167 = vmatmul.f32.gmra.mxu2 %v97_v18  ;;  %143 = vmatmul.f32.gmra.mxu0 %v89_v19 }
  0x37   :  { %440 = vmatpush.msra.mxu3 %v221_v47  ;;  %252 = vmatpush.msra.mxu1 %v221_v47 }
  0x3e   :  { %170 = vmatmul.f32.gmra.mxu2 %v98_v20  ;;  %146 = vmatmul.f32.gmra.mxu0 %v90_v21 }
  0x46   :  { %173 = vmatmul.f32.gmra.mxu2 %v99_v22  ;;  %149 = vmatmul.f32.gmra.mxu0 %v91_v23 }
  0x4e   :  { %176 = vmatmul.f32.gmra.mxu2 %v100_v28  ;;  %152 = vmatmul.f32.gmra.mxu0 %v92_v29 }
  0x56   :  { %179 = vmatmul.f32.gmra.mxu2 %v101_v34  ;;  %155 = vmatmul.f32.gmra.mxu0 %v93_v35 }
  0x5e   :  { %182 = vmatmul.f32.gmra.mxu2 %v102_v40  ;;  %158 = vmatmul.f32.gmra.mxu0 %v94_v41 }
  0x66   :  { %185 = vmatmul.f32.gmra.mxu2 %v103_v43  ;;  %161 = vmatmul.f32.gmra.mxu0 %v95_v44 }
  0xab   :  { %v141_v49 = vpop.f32.mrf.mxu0 }
  0xac   :  { %v142_v50 = vadd.f32 %v447_v48, %v141_v49 }
  0xae   :  { %v189_v51 = vmax.f32 %v142_v50, 0.0 }
  0xb0   :  { %253 = vmatmul.f32.vlgmr.msra.gmra.mxu1 %v189_v51 }
  0xb1   :  { %v165_v52 = vpop.f32.mrf.mxu2 }
  0xb2   :  { %v166_v53 = vadd.f32 %v447_v48, %v165_v52 }
  0xb3   :  { %v144_v54 = vpop.f32.mrf.mxu0 }
  0xb4   :  { %v197_v55 = vmax.f32 %v166_v53, 0.0  ;;  %v145_v56 = vadd.f32 %v447_v48, %v144_v54 }
  0xb6   :  { %277 = vmatmul.f32.vlgmr.msra.gmra.mxu3 %v197_v55  ;;  %v190_v57 = vmax.f32 %v145_v56, 0.0 }
  0xb8   :  { %256 = vmatmul.f32.gmra.mxu1 %v190_v57 }
  0xb9   :  { %v168_v58 = vpop.f32.mrf.mxu2 }
  0xba   :  { %v169_v59 = vadd.f32 %v447_v48, %v168_v58 }
  0xbb   :  { %v147_v60 = vpop.f32.mrf.mxu0 }
  0xbc   :  { %v198_v61 = vmax.f32 %v169_v59, 0.0  ;;  %v148_v62 = vadd.f32 %v447_v48, %v147_v60 }
  0xbe   :  { %280 = vmatmul.f32.gmra.mxu3 %v198_v61  ;;  %v191_v63 = vmax.f32 %v148_v62, 0.0 }
  0xc0   :  { %259 = vmatmul.f32.gmra.mxu1 %v191_v63 }
  0xc1   :  { %v171_v0 = vpop.f32.mrf.mxu2 }
  0xc2   :  { %v172_v1 = vadd.f32 %v447_v48, %v171_v0 }
  0xc3   :  { %v150_v2 = vpop.f32.mrf.mxu0 }
  0xc4   :  { %v199_v3 = vmax.f32 %v172_v1, 0.0  ;;  %v151_v4 = vadd.f32 %v447_v48, %v150_v2 }
  0xc6   :  { %283 = vmatmul.f32.gmra.mxu3 %v199_v3  ;;  %v192_v5 = vmax.f32 %v151_v4, 0.0 }
  0xc8   :  { %262 = vmatmul.f32.gmra.mxu1 %v192_v5 }
  0xc9   :  { %v174_v6 = vpop.f32.mrf.mxu2 }
  0xca   :  { %v175_v7 = vadd.f32 %v447_v48, %v174_v6 }
  0xcb   :  { %v153_v8 = vpop.f32.mrf.mxu0 }
  0xcc   :  { %v200_v9 = vmax.f32 %v175_v7, 0.0  ;;  %v154_v10 = vadd.f32 %v447_v48, %v153_v8 }
  0xce   :  { %286 = vmatmul.f32.gmra.mxu3 %v200_v9  ;;  %v193_v11 = vmax.f32 %v154_v10, 0.0 }
  0xd0   :  { %265 = vmatmul.f32.gmra.mxu1 %v193_v11 }
  0xd1   :  { %v177_v12 = vpop.f32.mrf.mxu2 }
  0xd2   :  { %v178_v13 = vadd.f32 %v447_v48, %v177_v12 }
  0xd3   :  { %v156_v14 = vpop.f32.mrf.mxu0 }
  0xd4   :  { %v201_v15 = vmax.f32 %v178_v13, 0.0  ;;  %v157_v16 = vadd.f32 %v447_v48, %v156_v14 }
  0xd6   :  { %289 = vmatmul.f32.gmra.mxu3 %v201_v15  ;;  %v194_v17 = vmax.f32 %v157_v16, 0.0 }
  0xd8   :  { %268 = vmatmul.f32.gmra.mxu1 %v194_v17 }
  0xd9   :  { %v180_v18 = vpop.f32.mrf.mxu2 }
  0xda   :  { %v181_v19 = vadd.f32 %v447_v48, %v180_v18 }
  0xdb   :  { %v159_v20 = vpop.f32.mrf.mxu0 }
  0xdc   :  { %v202_v21 = vmax.f32 %v181_v19, 0.0  ;;  %v160_v22 = vadd.f32 %v447_v48, %v159_v20 }
  0xde   :  { %292 = vmatmul.f32.gmra.mxu3 %v202_v21  ;;  %v195_v23 = vmax.f32 %v160_v22, 0.0 }
  0xe0   :  { %271 = vmatmul.f32.gmra.mxu1 %v195_v23 }
  0xe1   :  { %v183_v24 = vpop.f32.mrf.mxu2 }
  0xe2   :  { %v184_v25 = vadd.f32 %v447_v48, %v183_v24 }
  0xe3   :  { %v162_v26 = vpop.f32.mrf.mxu0 }
  0xe4   :  { %v203_v27 = vmax.f32 %v184_v25, 0.0  ;;  %v163_v28 = vadd.f32 %v447_v48, %v162_v26 }
  0xe6   :  { %295 = vmatmul.f32.gmra.mxu3 %v203_v27  ;;  %v196_v29 = vmax.f32 %v163_v28, 0.0 }
  0xe8   :  { %274 = vmatmul.f32.gmra.mxu1 %v196_v29 }
  0xe9   :  { %v186_v30 = vpop.f32.mrf.mxu2 }
  0xea   :  { %v187_v31 = vadd.f32 %v447_v48, %v186_v30 }
  0xec   :  { %v204_v32 = vmax.f32 %v187_v31, 0.0 }
  0xee   :  { %298 = vmatmul.f32.gmra.mxu3 %v204_v32 }
 0x12d   :  { %v254_v34 = vpop.f32.mrf.mxu1 }
 0x12e   :  { %v357_v35 = vadd.f32 %v448_v33, %v254_v34 }
 0x130   :  { %373 = vst [vmem:[#allocation9] sm:$0xff] %v357_v35 }
 0x135   :  { %v257_v36 = vpop.f32.mrf.mxu1 }
 0x136   :  { %v358_v37 = vadd.f32 %v448_v33, %v257_v36 }
 0x138   :  { %374 = vst [vmem:[#allocation9 + $0x8] sm:$0xff] %v358_v37 }
 0x139   :  { %v278_v38 = vpop.f32.mrf.mxu3 }
 0x13a   :  { %v365_v39 = vadd.f32 %v448_v33, %v278_v38 }
 0x13c   :  { %381 = vst [vmem:[#allocation9 + $0x40] sm:$0xff] %v365_v39 }
 0x13d   :  { %v260_v40 = vpop.f32.mrf.mxu1 }
 0x13e   :  { %v359_v41 = vadd.f32 %v448_v33, %v260_v40 }
 0x140   :  { %375 = vst [vmem:[#allocation9 + $0x10] sm:$0xff] %v359_v41 }
 0x141   :  { %v281_v42 = vpop.f32.mrf.mxu3 }
 0x142   :  { %v366_v43 = vadd.f32 %v448_v33, %v281_v42 }
 0x144   :  { %382 = vst [vmem:[#allocation9 + $0x48] sm:$0xff] %v366_v43 }
 0x145   :  { %v263_v44 = vpop.f32.mrf.mxu1 }
 0x146   :  { %v360_v45 = vadd.f32 %v448_v33, %v263_v44 }
 0x148   :  { %376 = vst [vmem:[#allocation9 + $0x18] sm:$0xff] %v360_v45 }
 0x149   :  { %v284_v46 = vpop.f32.mrf.mxu3 }
 0x14a   :  { %v367_v47 = vadd.f32 %v448_v33, %v284_v46 }
 0x14c   :  { %383 = vst [vmem:[#allocation9 + $0x50] sm:$0xff] %v367_v47 }
 0x14d   :  { %v266_v48 = vpop.f32.mrf.mxu1 }
 0x14e   :  { %v361_v49 = vadd.f32 %v448_v33, %v266_v48 }
 0x150   :  { %377 = vst [vmem:[#allocation9 + $0x20] sm:$0xff] %v361_v49 }
 0x151   :  { %v287_v50 = vpop.f32.mrf.mxu3 }
 0x152   :  { %v368_v51 = vadd.f32 %v448_v33, %v287_v50 }
 0x154   :  { %384 = vst [vmem:[#allocation9 + $0x58] sm:$0xff] %v368_v51 }
 0x155   :  { %v269_v52 = vpop.f32.mrf.mxu1 }
 0x156   :  { %v362_v53 = vadd.f32 %v448_v33, %v269_v52 }
 0x158   :  { %378 = vst [vmem:[#allocation9 + $0x28] sm:$0xff] %v362_v53 }
 0x159   :  { %v290_v54 = vpop.f32.mrf.mxu3 }
 0x15a   :  { %v369_v55 = vadd.f32 %v448_v33, %v290_v54 }
 0x15c   :  { %385 = vst [vmem:[#allocation9 + $0x60] sm:$0xff] %v369_v55 }
 0x15d   :  { %v272_v56 = vpop.f32.mrf.mxu1 }
 0x15e   :  { %v363_v57 = vadd.f32 %v448_v33, %v272_v56 }
 0x160   :  { %379 = vst [vmem:[#allocation9 + $0x30] sm:$0xff] %v363_v57 }
 0x161   :  { %v293_v58 = vpop.f32.mrf.mxu3 }
 0x162   :  { %v370_v59 = vadd.f32 %v448_v33, %v293_v58 }
 0x164   :  { %386 = vst [vmem:[#allocation9 + $0x68] sm:$0xff] %v370_v59 }
 0x165   :  { %v275_v60 = vpop.f32.mrf.mxu1 }
 0x166   :  { %v364_v61 = vadd.f32 %v448_v33, %v275_v60 }
 0x168   :  { %380 = vst [vmem:[#allocation9 + $0x38] sm:$0xff] %v364_v61 }
 0x169   :  { %v296_v62 = vpop.f32.mrf.mxu3 }
 0x16a   :  { %v371_v63 = vadd.f32 %v448_v33, %v296_v62 }
 0x16c   :  { %387 = vst [vmem:[#allocation9 + $0x70] sm:$0xff] %v371_v63 }
 0x171   :  { %v299_v0 = vpop.f32.mrf.mxu3 }
 0x172   :  { %v372_v1 = vadd.f32 %v448_v33, %v299_v0 }
 0x174   :  { %388 = vst [vmem:[#allocation9 + $0x78] sm:$0xff] %v372_v1 }
 0x175   :  { %401 = dma.vmem_to_hbm [thread:$0]  %s394_s10, 2048, %s396_s13, [#allocation5], %s552_s26, %s552_s26, %s553_s27  }
 0x176   :  { %549 = dma.done.wait [#allocation5], 2048  }
 0x177   :  { %550 = vsyncadd [#allocation5], 4294965248 }
 0x178   :  { %406 = vsyncpa [#allocation4], 1 }
 0x179   :  { %407 = vsyncpa [#allocation7], 1 }
 0x17a   :  { %408 = vsyncpa [#allocation5], 1 }

</bundles_post_ra>
